<compile_context>
chip_gen: v7x
topology: tpu7x:2x2x1
jax: 0.10.0
libtpu: 0.0.40
codegen_flags: <defaults>
</compile_context>

<pallas_src>
import functools

import jax
import jax.numpy as jnp
from jax.experimental import pallas as pl
from jax.experimental.pallas import tpu as pltpu


LANE = 128                                # channel padding target (lane-dense)


def _round_up(x, m):
    return (x + m - 1) // m * m


def _pad_to(a, shape):
    return jnp.pad(a, [(0, t - s) for s, t in zip(a.shape, shape)])


@functools.lru_cache(maxsize=1)
def _vmem_limit_bytes():
    """Generation-aware scoped-VMEM limit (headroom left for compiler scratch)."""
    cap = 128 * 1024 * 1024
    try:
        info = pltpu.get_tpu_info()
        cap = int(getattr(info, "vmem_capacity_bytes", None) or cap)
    except Exception:
        pass
    # v7x (64 MiB physical) -> 48 MiB; v5e/v6e (128 MiB) -> capped at 96 MiB.
    return int(max(32 << 20, min(cap - (16 << 20), 96 << 20)))


# ---------------------------------------------------------------------------
# Kernel 1: matmul + bias (+ optional fused residual add) (+ optional ReLU)
#           K grid collapsed: one jnp.dot per (TM, TN) tile, no accumulator RMW.
# ---------------------------------------------------------------------------
def _mm_kernel(*refs, relu, has_res):
    x_ref, w_ref, b_ref = refs[0], refs[1], refs[2]
    r_ref = refs[3] if has_res else None
    o_ref = refs[-1]

    y = jnp.dot(x_ref[...], w_ref[...], preferred_element_type=jnp.float32)
    y = y + b_ref[...]
    if has_res:
        y = y + r_ref[...].astype(jnp.float32)
    if relu:
        y = jnp.maximum(y, 0.0)
    o_ref[...] = y.astype(o_ref.dtype)


def matmul_bias_act(x, w, bias, residual=None, relu=False,
                    out_dtype=jnp.bfloat16):
    """x:(M,K) bf16, w:(K,N) bf16 (BN scale pre-folded), bias:(N,) f32.

    Returns (M, N) in out_dtype. Optionally fuses `residual` add + ReLU.
    """
    M, K = x.shape
    Kw, N = w.shape
    assert K == Kw and K % LANE == 0 and N % LANE == 0

    # Big row tiles when M is large; pad the remainder rather than TM == M.
    TM = 512 if M >= 512 else _round_up(M, 8)
    Mp = _round_up(M, TM)
    if Mp != M:
        x = jnp.pad(x, ((0, Mp - M), (0, 0)))
        if residual is not None:
            residual = jnp.pad(residual, ((0, Mp - M), (0, 0)))

    # Wide N tiles (fewer re-reads of the activation slab across j).
    if N <= 512:
        TN = N
    elif N % 512 == 0:
        TN = 512
    elif N % 256 == 0:
        TN = 256
    else:
        TN = 128
    grid = (Mp // TM, N // TN)

    in_specs = [
        pl.BlockSpec((TM, K), lambda i, j: (i, 0)),
        pl.BlockSpec((K, TN), lambda i, j: (0, j)),
        pl.BlockSpec((1, TN), lambda i, j: (0, j)),
    ]
    args = [x, w, bias.reshape(1, N).astype(jnp.float32)]
    if residual is not None:
        in_specs.append(pl.BlockSpec((TM, TN), lambda i, j: (i, j)))
        args.append(residual)

    out = pl.pallas_call(
        functools.partial(_mm_kernel, relu=relu, has_res=residual is not None),
        out_shape=jax.ShapeDtypeStruct((Mp, N), out_dtype),
        grid=grid,
        in_specs=in_specs,
        out_specs=pl.BlockSpec((TM, TN), lambda i, j: (i, j)),
        compiler_params=pltpu.CompilerParams(
            dimension_semantics=("parallel", "parallel"),
            vmem_limit_bytes=_vmem_limit_bytes()),
    )(*args)
    return out[:M] if Mp != M else out


# ---------------------------------------------------------------------------
# Kernel 2: 3x3 conv (padding=1, stride s) + folded-BN bias + ReLU
#           9 tap-matmuls over shifted flat views of the per-image phase plane,
#           accumulated per output-row band so the f32 acc stays in registers.
# ---------------------------------------------------------------------------
def _conv3x3_kernel(x_ref, w_ref, b_ref, o_ref, *, stride, Wq, band_flat):
    band = pl.program_id(1)
    base = pl.multiple_of(band * band_flat, 8)        # band_flat % 8 == 0
    Co = o_ref.shape[-1]

    acc = jnp.zeros((band_flat, Co), jnp.float32)
    for t in range(9):                                 # 9 taps, statically unrolled
        dy, dx = t // 3, t % 3
        ph = (dy % stride) * stride + (dx % stride)    # static phase index
        off = (dy // stride) * Wq + (dx // stride)     # static flat tap offset
        xs = x_ref[ph, 0, pl.ds(base + off, band_flat), :]
        acc = acc + jnp.dot(xs, w_ref[t], preferred_element_type=jnp.float32)
    o_ref[0] = jnp.maximum(acc + b_ref[...], 0.0).astype(o_ref.dtype)


def conv3x3_bn_relu(y_nhwc, w_taps, bias, stride):
    """y:(N,H,W,C) bf16, w_taps:(9,C,Co) bf16 (BN-folded), bias:(Co,) f32."""
    N, H, W, C = y_nhwc.shape
    Co = w_taps.shape[-1]
    Ho = (H + 2 - 3) // stride + 1
    Wo = (W + 2 - 3) // stride + 1
    pad_o = 2 // stride                       # max tap offset within a phase
    Wq = _round_up(Wo + pad_o, 8)             # sublane-aligned row pitch

    # Output-row band: keep the per-band f32 accumulator ~<=128 KiB so it lives
    # in registers (no VMEM spill / RMW), and give v7x a second parallel axis.
    target_flat = max(8, 32768 // Co)
    TH = max(1, min(Ho, max(1, target_flat // Wq)))
    n_bands = pl.cdiv(Ho, TH)
    Ho_pad = n_bands * TH
    band_flat = TH * Wq

    Hq = Ho_pad + pad_o + 1                   # per-phase plane height, flat-read safe
    # zero-pad: conv padding=1 at top/left, extra zeros bottom/right for phases
    yp = jnp.pad(y_nhwc, ((0, 0),
                          (1, stride * Hq - H - 1),
                          (1, stride * Wq - W - 1),
                          (0, 0)))
    if stride == 1:
        # single phase -> pure reshape, no stacked copy on the common path
        phases = yp.reshape(N, Hq * Wq, C)[None]
    else:
        # stride-phase decomposition (pure reorganization, same total bytes)
        phases = jnp.stack(
            [yp[:, py::stride, px::stride, :].reshape(N, Hq * Wq, C)
             for py in range(stride) for px in range(stride)], axis=0)

    out = pl.pallas_call(
        functools.partial(_conv3x3_kernel, stride=stride, Wq=Wq,
                          band_flat=band_flat),
        out_shape=jax.ShapeDtypeStruct((N, Ho_pad * Wq, Co), jnp.bfloat16),
        grid=(N, n_bands),
        in_specs=[
            pl.BlockSpec((stride * stride, 1, Hq * Wq, C),
                         lambda n, b: (0, n, 0, 0)),
            pl.BlockSpec((9, C, Co), lambda n, b: (0, 0, 0)),
            pl.BlockSpec((1, Co), lambda n, b: (0, 0)),
        ],
        out_specs=pl.BlockSpec((1, band_flat, Co), lambda n, b: (n, b, 0)),
        compiler_params=pltpu.CompilerParams(
            dimension_semantics=("parallel", "parallel"),
            vmem_limit_bytes=_vmem_limit_bytes()),
    )(phases, w_taps, bias.reshape(1, Co).astype(jnp.float32))
    # crop the wrap-around / alignment garbage rows and columns
    return out.reshape(N, Ho_pad, Wq, Co)[:, :Ho, :Wo, :]    # (N, Ho, Wo, Co) bf16


# ---------------------------------------------------------------------------
# Parameter prep / BN folding
# ---------------------------------------------------------------------------
def bn_fold(gamma, beta, mean, var, eps=1e-5):
    scale = gamma / jnp.sqrt(var + eps)
    bias = beta - mean * scale
    return scale, bias


def init_params(key, in_channels, out_channels, stride, expansion=4):
    cmid = out_channels
    cout = out_channels * expansion
    ks = jax.random.split(key, 12)

    def bn_params(k, c):
        k1, k2, k3, k4 = jax.random.split(k, 4)
        gamma = jax.random.uniform(k1, (c,), jnp.float32, 0.5, 1.5)
        beta = jax.random.normal(k2, (c,), jnp.float32) * 0.1
        mean = jax.random.normal(k3, (c,), jnp.float32) * 0.1
        var = jax.random.uniform(k4, (c,), jnp.float32, 0.5, 1.5)
        return (gamma, beta, mean, var)

    p = {
        "w1": jax.random.normal(ks[0], (cmid, in_channels, 1, 1), jnp.float32) * 0.1,
        "bn1": bn_params(ks[1], cmid),
        "w2": jax.random.normal(ks[2], (cmid, cmid, 3, 3), jnp.float32) * 0.1,
        "bn2": bn_params(ks[3], cmid),
        "w3": jax.random.normal(ks[4], (cout, cmid, 1, 1), jnp.float32) * 0.1,
        "bn3": bn_params(ks[5], cout),
    }
    if stride != 1 or in_channels != cout:
        p["ws"] = jax.random.normal(ks[6], (cout, in_channels, 1, 1), jnp.float32) * 0.1
        p["bns"] = bn_params(ks[7], cout)
    return p


# ---------------------------------------------------------------------------
# BottleNeck forward (NCHW in / NCHW out, matching the PyTorch module)
# ---------------------------------------------------------------------------
def bottleneck_forward(x_nchw, params, stride):
    x = jnp.transpose(x_nchw, (0, 2, 3, 1)).astype(jnp.float32)   # NHWC
    N, H, W, Cin = x.shape
    Cmid = params["w1"].shape[0]
    Cout = params["w3"].shape[0]
    Cin_p, Cm_p, Co_p = (_round_up(c, LANE) for c in (Cin, Cmid, Cout))

    s1, b1 = bn_fold(*params["bn1"])
    s2, b2 = bn_fold(*params["bn2"])
    s3, b3 = bn_fold(*params["bn3"])

    # Fold BN scale into weights, zero-pad channels to lane-dense sizes, cast bf16.
    w1 = params["w1"][:, :, 0, 0].T * s1[None, :]                  # (Cin, Cmid)
    w1 = _pad_to(w1, (Cin_p, Cm_p)).astype(jnp.bfloat16)
    b1p = _pad_to(b1, (Cm_p,))

    w2 = jnp.transpose(params["w2"], (2, 3, 1, 0)).reshape(9, Cmid, Cmid)
    w2 = w2 * s2[None, None, :]                                    # (9, Cmid, Cmid)
    w2 = _pad_to(w2, (9, Cm_p, Cm_p)).astype(jnp.bfloat16)
    b2p = _pad_to(b2, (Cm_p,))

    w3 = params["w3"][:, :, 0, 0].T * s3[None, :]                  # (Cmid, Cout)
    w3 = _pad_to(w3, (Cm_p, Co_p)).astype(jnp.bfloat16)
    b3p = _pad_to(b3, (Co_p,))

    Ho = (H + 2 - 3) // stride + 1
    Wo = (W + 2 - 3) // stride + 1

    x_slab = _pad_to(x.reshape(N * H * W, Cin), (N * H * W, Cin_p)).astype(jnp.bfloat16)

    # ---- conv1 (1x1) + BN + ReLU ------------------------------------------
    y1 = matmul_bias_act(x_slab, w1, b1p, relu=True, out_dtype=jnp.bfloat16)
    y1 = y1.reshape(N, H, W, Cm_p)

    # ---- conv2 (3x3, stride, pad=1) + BN + ReLU (no im2col) ----------------
    y2 = conv3x3_bn_relu(y1, w2, b2p, stride)                      # (N, Ho, Wo, Cm_p)
    y2 = y2.reshape(N * Ho * Wo, Cm_p)

    # ---- shortcut -----------------------------------------------------------
    if "ws" in params:
        ss, bs = bn_fold(*params["bns"])
        ws = params["ws"][:, :, 0, 0].T * ss[None, :]              # (Cin, Cout)
        ws = _pad_to(ws, (Cin_p, Co_p)).astype(jnp.bfloat16)
        bsp = _pad_to(bs, (Co_p,))
        xs = x[:, ::stride, ::stride, :][:, :Ho, :Wo, :]           # 1x1 strided conv input
        xs = _pad_to(xs.reshape(N * Ho * Wo, Cin), (N * Ho * Wo, Cin_p)).astype(jnp.bfloat16)
        sc = matmul_bias_act(xs, ws, bsp, relu=False, out_dtype=jnp.bfloat16)
    else:
        # identity shortcut (stride == 1 and Cin == Cout) -> padded widths match
        sc = x_slab

    # ---- conv3 (1x1) + BN + fused residual add + ReLU -----------------------
    out = matmul_bias_act(y2, w3, b3p, residual=sc, relu=True,
                          out_dtype=jnp.bfloat16)                  # (N*Ho*Wo, Co_p) bf16
    out = out[:, :Cout].reshape(N, Ho, Wo, Cout)
    # keep slice/transpose in bf16; upcast to f32 only at the interface boundary
    return jnp.transpose(out, (0, 3, 1, 2)).astype(jnp.float32)    # NCHW


# ---------------------------------------------------------------------------
# Pure-JAX f32 reference (for the correctness check)
# ---------------------------------------------------------------------------
def _conv_ref(x_nhwc, w_pt, stride, padding):
    w_hwio = jnp.transpose(w_pt, (2, 3, 1, 0))
    return jax.lax.conv_general_dilated(
        x_nhwc, w_hwio, (stride, stride), padding,
        dimension_numbers=("NHWC", "HWIO", "NHWC"))


def bottleneck_ref(x_nchw, params, stride, eps=1e-5):
    x = jnp.transpose(x_nchw, (0, 2, 3, 1)).astype(jnp.float32)

    def bn(y, p):
        g, b, m, v = p
        return (y - m) / jnp.sqrt(v + eps) * g + b

    y = jax.nn.relu(bn(_conv_ref(x, params["w1"], 1, "VALID"), params["bn1"]))
    y = jax.nn.relu(bn(_conv_ref(y, params["w2"], stride, ((1, 1), (1, 1))), params["bn2"]))
    y = bn(_conv_ref(y, params["w3"], 1, "VALID"), params["bn3"])
    sc = x if "ws" not in params else bn(_conv_ref(x, params["ws"], stride, "VALID"),
                                         params["bns"])
    out = jax.nn.relu(y + sc)
    return jnp.transpose(out, (0, 3, 1, 2))


# ---------------------------------------------------------------------------
if __name__ == "__main__":
    key = jax.random.PRNGKey(0)
    cases = [
        # (batch, in_ch, H, W, out_ch, stride)
        (2, 16, 8, 8, 8, 2),   # downsample shortcut + strided 3x3 conv
        (2, 32, 8, 8, 8, 1),   # identity shortcut + stride-1 3x3 conv
    ]
    for i, (nb, cin, H, W, cout, s) in enumerate(cases):
        kx, kp = jax.random.split(jax.random.fold_in(key, i))
        x = jax.random.normal(kx, (nb, cin, H, W), jnp.float32)
        params = init_params(kp, cin, cout, s)

        out = jax.block_until_ready(bottleneck_forward(x, params, s))
        ref = jax.block_until_ready(bottleneck_ref(x, params, s))

        Ho = (H - 1) // s + 1
        assert out.shape == (nb, cout * 4, Ho, Ho), out.shape
        max_err = float(jnp.max(jnp.abs(out - ref)))
        # bf16 matmul inputs + bf16 final store (f32 accumulation) -> relaxed tol
        assert jnp.allclose(out, ref, atol=1e-1, rtol=5e-2), \
            f"case {i}: max err = {max_err}"

    print("KERNEL_OK")
</pallas_src>

<mosaic_0001>
module attributes {stable_mosaic.version = 11 : i64} {
  func.func @_mm_kernel(%arg0: i32, %arg1: i32, %arg2: memref<128x128xbf16, #tpu.memory_space<vmem>>, %arg3: memref<128x128xbf16, #tpu.memory_space<vmem>>, %arg4: memref<1x128xf32, #tpu.memory_space<vmem>>, %arg5: memref<128x128xbf16, #tpu.memory_space<vmem>>) attributes {dimension_semantics = [#tpu.dimension_semantics<parallel>, #tpu.dimension_semantics<parallel>], iteration_bounds = array<i64: 1, 1>, scalar_prefetch = 0 : i64, scratch_operands = 0 : i64, tpu.core_type = #tpu.core_type<tc>, window_params = [{transform_indices = @transform_0, window_bounds = array<i64: 128, 128>}, {transform_indices = @transform_1, window_bounds = array<i64: 128, 128>}, {transform_indices = @transform_2, window_bounds = array<i64: 1, 128>}, {transform_indices = @transform_3, window_bounds = array<i64: 128, 128>}]} {
    %c0 = arith.constant 0 : index
    %c0_0 = arith.constant 0 : index
    %0 = vector.load %arg2[%c0, %c0_0] : memref<128x128xbf16, #tpu.memory_space<vmem>>, vector<128x128xbf16>
    %c0_1 = arith.constant 0 : index
    %c0_2 = arith.constant 0 : index
    %1 = vector.load %arg3[%c0_1, %c0_2] : memref<128x128xbf16, #tpu.memory_space<vmem>>, vector<128x128xbf16>
    %cst = arith.constant dense<0.000000e+00> : vector<128x128xf32>
    %2 = tpu.matmul %0, %1, %cst {dimension_numbers = #tpu.dot_dimension_numbers<[1], [0], [0], [1], [0, 0, 1, 1], [], []>} : vector<128x128xbf16>, vector<128x128xbf16>, vector<128x128xf32> -> vector<128x128xf32>
    %c0_3 = arith.constant 0 : index
    %c0_4 = arith.constant 0 : index
    %3 = vector.load %arg4[%c0_3, %c0_4] : memref<1x128xf32, #tpu.memory_space<vmem>>, vector<1x128xf32>
    %4 = vector.broadcast %3 : vector<1x128xf32> to vector<128x128xf32>
    %5 = arith.addf %2, %4 : vector<128x128xf32>
    %cst_5 = arith.constant 0.000000e+00 : f32
    %6 = vector.broadcast %cst_5 : f32 to vector<128x128xf32>
    %7 = arith.maximumf %5, %6 : vector<128x128xf32>
    %8 = arith.truncf %7 : vector<128x128xf32> to vector<128x128xbf16>
    %c0_6 = arith.constant 0 : index
    %c0_7 = arith.constant 0 : index
    %9 = vector.load %arg5[%c0_6, %c0_7] : memref<128x128xbf16, #tpu.memory_space<vmem>>, vector<128x128xbf16>
    tpu.vector_store %arg5[%c0_6, %c0_7], %8 {strides = array<i32>} : memref<128x128xbf16, #tpu.memory_space<vmem>>, vector<128x128xbf16>,
    return
  }
  func.func @transform_0(%arg0: i32, %arg1: i32) -> (i32, i32) {
    %c0_i32 = arith.constant 0 : i32
    %c0_i32_0 = arith.constant 0 : i32
    return %arg0, %c0_i32 : i32, i32
  }
  func.func @transform_1(%arg0: i32, %arg1: i32) -> (i32, i32) {
    %c0_i32 = arith.constant 0 : i32
    %c0_i32_0 = arith.constant 0 : i32
    return %c0_i32, %arg1 : i32, i32
  }
  func.func @transform_2(%arg0: i32, %arg1: i32) -> (i32, i32) {
    %c0_i32 = arith.constant 0 : i32
    %c0_i32_0 = arith.constant 0 : i32
    return %c0_i32, %arg1 : i32, i32
  }
  func.func @transform_3(%arg0: i32, %arg1: i32) -> (i32, i32) {
    %c0_i32 = arith.constant 0 : i32
    return %arg0, %arg1 : i32, i32
  }
}

</mosaic_0001>

<bundles_post_ra>
// kernel: tpu_custom_call.1
= control target key start
LH: loop header
LB: loop body
LE: loop exit
PB: predicated region body
PF: predicated region fallthrough
CT: control target
= control target key end

     0   :  { %8 = vsyncpa [#allocation3], 0  ;;  %s767_s0 = inlined_call_operand.hbm [shape: bf16[128,128], index: 0, kind: input, shape index: {}]   ;;  %s768_s1 = inlined_call_operand.hbm [shape: bf16[128,128], index: 1, kind: input, shape index: {}]   ;;  %s769_s2 = inlined_call_operand.hbm [shape: f32[1,128], index: 2, kind: input, shape index: {}]   ;;  %s770_s3 = inlined_call_operand.hbm [shape: bf16[128,128], index: 3, kind: output, shape index: {}]  }
   0x1   :  { %9 = vsyncpa [#allocation6], 0 }
   0x2   :  { %10 = vsyncpa [#allocation4], 0  ;;  %s677_s12 = smov [#allocation5]   ;;  %s678_s14 = smov [#allocation2]  }
   0x3   :  { %s28_s13 = sshll.u32 %s677_s12, 4  ;;  %s16_s15 = sshll.u32 %s678_s14, 4  ;;  %s29_s13 = int_to_ptr.vmem [resolvable:$true] %s28_s13  ;;  %s703_s15 = int_to_ptr.vmem [resolvable:$true] %s16_s15 }
   0x4   :  { %s583_s18 = scalar_lea.hbm %s768_s1, 1024 }
   0x5   :  { %p584_p0 = scmp.ne.s32.totalorder %s768_s1, %s583_s18  ;;  %p587_p1 = scmp.lt.u32.totalorder %s583_s18, %s768_s1 }
   0x7   :  { %p589_p2 = pnand %p587_p1, %p584_p0 }
   0x9   :  { %592 = shalt.err (!%p589_p2)
}
   0xa   :  { %s593_s23 = scalar_lea.vmem %s29_s13, 1024  ;;  %p598_p4 = scmp.lt.s32.totalorder %s29_s13, %s29_s13 }
   0xb   :  { %p594_p3 = scmp.ne.s32.totalorder %s29_s13, %s593_s23  ;;  %p599_p5 = scmp.lt.s32.totalorder %s593_s23, %s593_s23 }
   0xd   :  { %p600_p6 = por %p599_p5, %p598_p4 }
   0xf   :  { %p601_p7 = pnand %p600_p6, %p594_p3 }
  0x11   :  { %604 = shalt.err (!%p601_p7)
}
  0x12   :  { %s679_s24 = smov 64   ;;  %s680_s25 = smov 4  }
  0x13   :  { %34 = dma.hbm_to_vmem [thread:$0]  %s768_s1, 1024, %s29_s13, [#allocation6], %s679_s24, %s679_s24, %s680_s25  }
  0x14   :  { %s605_s30 = scalar_lea.hbm %s767_s0, 1024 }
  0x15   :  { %p606_p8 = scmp.ne.s32.totalorder %s767_s0, %s605_s30  ;;  %p609_p9 = scmp.lt.u32.totalorder %s605_s30, %s767_s0 }
  0x17   :  { %p611_p10 = pnand %p609_p9, %p606_p8 }
  0x19   :  { %614 = shalt.err (!%p611_p10)
}
  0x1a   :  { %s615_s8 = scalar_lea.vmem %s703_s15, 1024  ;;  %p620_p12 = scmp.lt.s32.totalorder %s703_s15, %s703_s15 }
  0x1b   :  { %p616_p11 = scmp.ne.s32.totalorder %s703_s15, %s615_s8  ;;  %p621_p13 = scmp.lt.s32.totalorder %s615_s8, %s615_s8 }
  0x1d   :  { %p622_p0 = por %p621_p13, %p620_p12 }
  0x1f   :  { %p623_p1 = pnand %p622_p0, %p616_p11 }
  0x21   :  { %626 = shalt.err (!%p623_p1)
}
  0x22   :  { %22 = dma.hbm_to_vmem [thread:$0]  %s767_s0, 1024, %s703_s15, [#allocation3], %s679_s24, %s679_s24, %s680_s25  }
  0x23   :  { %s681_s10 = smov [#allocation7]   ;;  %s627_s14 = scalar_lea.hbm %s769_s2, 16 }
  0x24   :  { %s41_s11 = sshll.u32 %s681_s10, 4  ;;  %p628_p2 = scmp.ne.s32.totalorder %s769_s2, %s627_s14  ;;  %s42_s11 = int_to_ptr.vmem [resolvable:$true] %s41_s11 }
  0x25   :  { %p631_p3 = scmp.lt.u32.totalorder %s627_s14, %s769_s2 }
  0x27   :  { %p633_p4 = pnand %p631_p3, %p628_p2 }
  0x29   :  { %636 = shalt.err (!%p633_p4)
}
  0x2a   :  { %s637_s20 = scalar_lea.vmem %s42_s11, 16  ;;  %s641_s0 = scalar_lea.vmem %s42_s11, 32 }
  0x2b   :  { %p638_p5 = scmp.ne.s32.totalorder %s42_s11, %s637_s20  ;;  %p642_p6 = scmp.lt.s32.totalorder %s42_s11, %s42_s11 }
  0x2c   :  { %p643_p7 = scmp.lt.s32.totalorder %s641_s0, %s637_s20 }
  0x2e   :  { %p644_p8 = por %p643_p7, %p642_p6 }
  0x30   :  { %p645_p9 = pnand %p644_p8, %p638_p5 }
  0x32   :  { %648 = shalt.err (!%p645_p9)
}
  0x33   :  { %44 = dma.hbm_to_vmem [thread:$0]  %s769_s2, 16, %s42_s11, [#allocation6]  }
  0x34   :  { %671 = dma.done.wait [#allocation3], 1024  }
  0x35   :  { %672 = vsyncadd [#allocation3], 4294966272 }
  0x36   :  { %673 = dma.done.wait [#allocation6], 1040  }
  0x37   :  { %674 = vsyncadd [#allocation6], 4294966256  ;;  %v567_v0 = vld [vmem:[#allocation5] sm:$0xff]   ;;  %v568_v1 = vld [vmem:[#allocation5 + $0x8] sm:$0xff]   ;;  %s682_s2 = smov [#allocation8]  }
  0x38   :  { %513 = vmatprep.subr.bf16.mxu0 %v567_v0  ;;  %545 = vmatprep.subr.bf16.mxu1 %v567_v0  ;;  %v569_v2 = vld [vmem:[#allocation5 + $0x10] sm:$0xff]   ;;  %v570_v3 = vld [vmem:[#allocation5 + $0x18] sm:$0xff]   ;;  %v575_v4 = vld [vmem:[#allocation2] sm:$0xff]   ;;  %s388_s22 = sshll.u32 %s682_s2, 4  ;;  %s389_s22 = int_to_ptr.vmem [resolvable:$true] %s388_s22 }
  0x39   :  { %514 = vmatpush3.bf16.msra.mxu0 %v567_v0  ;;  %553 = vmatpush3.bf16.msra.mxu1 %v567_v0  ;;  %v576_v5 = vld [vmem:[#allocation2 + $0x20] sm:$0xff]   ;;  %v572_v7 = vld [vmem:[#allocation5 + $0x28] sm:$0xff]   ;;  %v573_v8 = vld [vmem:[#allocation5 + $0x30] sm:$0xff]   ;;  %s649_s23 = scalar_lea.vmem %s389_s22, 1024  ;;  %p654_p11 = scmp.lt.s32.totalorder %s389_s22, %s389_s22 }
  0x3a   :  { %515 = vmatprep.subr.bf16.mxu0 %v568_v1  ;;  %546 = vmatprep.subr.bf16.mxu1 %v568_v1  ;;  %v571_v6 = vld [vmem:[#allocation5 + $0x20] sm:$0xff]   ;;  %v574_v9 = vld [vmem:[#allocation5 + $0x38] sm:$0xff]   ;;  %v577_v10 = vld [vmem:[#allocation2 + $0x8] sm:$0xff]   ;;  %p650_p10 = scmp.ne.s32.totalorder %s389_s22, %s649_s23  ;;  %p655_p12 = scmp.lt.s32.totalorder %s649_s23, %s649_s23 }
  0x3b   :  { %529 = vmatprep.mubr.bf16.mxu0 %v575_v4  ;;  %537 = vmatprep.mubr.bf16.mxu1 %v576_v5  ;;  %v578_v11 = vld [vmem:[#allocation2 + $0x28] sm:$0xff]   ;;  %v579_v12 = vld [vmem:[#allocation2 + $0x10] sm:$0xff]   ;;  %v581_v14 = vld [vmem:[#allocation2 + $0x18] sm:$0xff]  }
  0x3c   :  { %v580_v13 = vld [vmem:[#allocation2 + $0x30] sm:$0xff]   ;;  %v582_v15 = vld [vmem:[#allocation2 + $0x38] sm:$0xff]   ;;  %v401_v16 = vld [vmem:[#allocation7] ss:$0 sm:$0xff]  ;;  %p656_p13 = por %p655_p12, %p654_p11 }
  0x3d   :  { %516 = vmatpush3.bf16.msra.mxu0 %v568_v1  ;;  %554 = vmatpush3.bf16.msra.mxu1 %v568_v1 }
  0x3e   :  { %517 = vmatprep.subr.bf16.mxu0 %v569_v2  ;;  %547 = vmatprep.subr.bf16.mxu1 %v569_v2  ;;  %p657_p0 = pnand %p656_p13, %p650_p10 }
  0x41   :  { %518 = vmatpush3.bf16.msra.mxu0 %v569_v2  ;;  %555 = vmatpush3.bf16.msra.mxu1 %v569_v2 }
  0x42   :  { %519 = vmatprep.subr.bf16.mxu0 %v570_v3  ;;  %548 = vmatprep.subr.bf16.mxu1 %v570_v3 }
  0x45   :  { %520 = vmatpush3.bf16.msra.mxu0 %v570_v3  ;;  %556 = vmatpush3.bf16.msra.mxu1 %v570_v3 }
  0x46   :  { %521 = vmatprep.subr.bf16.mxu0 %v571_v6  ;;  %549 = vmatprep.subr.bf16.mxu1 %v571_v6 }
  0x49   :  { %522 = vmatpush3.bf16.msra.mxu0 %v571_v6  ;;  %557 = vmatpush3.bf16.msra.mxu1 %v571_v6 }
  0x4a   :  { %523 = vmatprep.subr.bf16.mxu0 %v572_v7  ;;  %550 = vmatprep.subr.bf16.mxu1 %v572_v7 }
  0x4d   :  { %524 = vmatpush3.bf16.msra.mxu0 %v572_v7  ;;  %558 = vmatpush3.bf16.msra.mxu1 %v572_v7 }
  0x4e   :  { %525 = vmatprep.subr.bf16.mxu0 %v573_v8  ;;  %551 = vmatprep.subr.bf16.mxu1 %v573_v8 }
  0x51   :  { %526 = vmatpush3.bf16.msra.mxu0 %v573_v8  ;;  %559 = vmatpush3.bf16.msra.mxu1 %v573_v8 }
  0x52   :  { %527 = vmatprep.subr.bf16.mxu0 %v574_v9  ;;  %552 = vmatprep.subr.bf16.mxu1 %v574_v9 }
  0x55   :  { %528 = vmatpush3.bf16.msra.mxu0 %v574_v9  ;;  %560 = vmatpush3.bf16.msra.mxu1 %v574_v9 }
  0x58   :  { %530 = vmatmul.mubr.bf16.vlgmr.msra.gmra.mrb[0].mxu0 %v577_v10  ;;  %538 = vmatmul.mubr.bf16.vlgmr.msra.gmra.mrb[0].mxu1 %v578_v11 }
  0x59   :  { %533 = vmatprep.mubr.bf16.mxu0 %v579_v12  ;;  %541 = vmatprep.mubr.bf16.mxu1 %v580_v13 }
  0x60   :  { %534 = vmatmul.mubr.bf16.gmra.mrb[4].mxu0 %v581_v14  ;;  %542 = vmatmul.mubr.bf16.gmra.mrb[4].mxu1 %v582_v15 }
 0x12b   :  { %v531_v17 = vpop.f32.mrb[0].mxu0  ;;  %v539_v18 = vpop.f32.mrb[0].mxu1 }
 0x12c   :  { %v233_v19 = vadd.f32 %v531_v17, %v401_v16  ;;  %v265_v20 = vadd.f32 %v539_v18, %v401_v16  ;;  %v224_v21 = vpop.f32.mrb[1].mxu0  ;;  %v256_v22 = vpop.f32.mrb[1].mxu1 }
 0x12d   :  { %v225_v23 = vadd.f32 %v401_v16, %v224_v21  ;;  %v257_v24 = vadd.f32 %v401_v16, %v256_v22  ;;  %v532_v25 = vpop.f32.mrb[2].mxu0  ;;  %v540_v26 = vpop.f32.mrb[2].mxu1 }
 0x12e   :  { %v236_v27 = vadd.f32 %v532_v25, %v401_v16  ;;  %v268_v28 = vadd.f32 %v540_v26, %v401_v16  ;;  %v227_v29 = vpop.f32.mrb[3].mxu0  ;;  %v259_v30 = vpop.f32.mrb[3].mxu1  ;;  %v289_v33 = vmax.f32 %v233_v19, 0.0  ;;  %v297_v34 = vmax.f32 %v265_v20, 0.0 }
 0x12f   :  { %v228_v31 = vadd.f32 %v401_v16, %v227_v29  ;;  %v260_v32 = vadd.f32 %v401_v16, %v259_v30  ;;  %v287_v37 = vmax.f32 %v225_v23, 0.0  ;;  %v295_v38 = vmax.f32 %v257_v24, 0.0 }
 0x130   :  { %v290_v35 = vmax.f32 %v236_v27, 0.0  ;;  %v298_v36 = vmax.f32 %v268_v28, 0.0 }
 0x131   :  { %v288_v39 = vmax.f32 %v228_v31, 0.0  ;;  %v296_v40 = vmax.f32 %v260_v32, 0.0 }
 0x132   :  { %v458_v41 = vpack.c.bf16 %v290_v35, %v289_v33  ;;  %v478_v42 = vpack.c.bf16 %v298_v36, %v297_v34 }
 0x133   :  { %v453_v43 = vpack.c.bf16 %v288_v39, %v287_v37  ;;  %v473_v44 = vpack.c.bf16 %v296_v40, %v295_v38  ;;  %v535_v45 = vpop.f32.mrb[4].mxu0  ;;  %v543_v46 = vpop.f32.mrb[4].mxu1 }
 0x134   :  { %490 = vst [vmem:[#allocation8 + $0x8] sm:$0xff] %v458_v41   ;;  %494 = vst [vmem:[#allocation8 + $0x28] sm:$0xff] %v478_v42   ;;  %v249_v47 = vadd.f32 %v535_v45, %v401_v16  ;;  %v281_v48 = vadd.f32 %v543_v46, %v401_v16  ;;  %v240_v49 = vpop.f32.mrb[5].mxu0  ;;  %v272_v50 = vpop.f32.mrb[5].mxu1 }
 0x135   :  { %454 = vst [vmem:[#allocation8] sm:$0xff] %v453_v43   ;;  %493 = vst [vmem:[#allocation8 + $0x20] sm:$0xff] %v473_v44   ;;  %v241_v51 = vadd.f32 %v401_v16, %v240_v49  ;;  %v273_v52 = vadd.f32 %v401_v16, %v272_v50  ;;  %v536_v53 = vpop.f32.mrb[6].mxu0  ;;  %v544_v54 = vpop.f32.mrb[6].mxu1 }
 0x136   :  { %v252_v55 = vadd.f32 %v536_v53, %v401_v16  ;;  %v284_v56 = vadd.f32 %v544_v54, %v401_v16  ;;  %v243_v57 = vpop.f32.mrb[7].mxu0  ;;  %v275_v58 = vpop.f32.mrb[7].mxu1  ;;  %v293_v61 = vmax.f32 %v249_v47, 0.0  ;;  %v301_v62 = vmax.f32 %v281_v48, 0.0 }
 0x137   :  { %v244_v59 = vadd.f32 %v401_v16, %v243_v57  ;;  %v276_v60 = vadd.f32 %v401_v16, %v275_v58  ;;  %v291_v1 = vmax.f32 %v241_v51, 0.0  ;;  %v299_v2 = vmax.f32 %v273_v52, 0.0 }
 0x138   :  { %v294_v63 = vmax.f32 %v252_v55, 0.0  ;;  %v302_v0 = vmax.f32 %v284_v56, 0.0 }
 0x139   :  { %v292_v3 = vmax.f32 %v244_v59, 0.0  ;;  %v300_v4 = vmax.f32 %v276_v60, 0.0 }
 0x13a   :  { %v468_v5 = vpack.c.bf16 %v294_v63, %v293_v61  ;;  %v488_v6 = vpack.c.bf16 %v302_v0, %v301_v62 }
 0x13b   :  { %v463_v7 = vpack.c.bf16 %v292_v3, %v291_v1  ;;  %v483_v8 = vpack.c.bf16 %v300_v4, %v299_v2 }
 0x13c   :  { %492 = vst [vmem:[#allocation8 + $0x18] sm:$0xff] %v468_v5   ;;  %496 = vst [vmem:[#allocation8 + $0x38] sm:$0xff] %v488_v6  }
 0x13d   :  { %491 = vst [vmem:[#allocation8 + $0x10] sm:$0xff] %v463_v7   ;;  %495 = vst [vmem:[#allocation8 + $0x30] sm:$0xff] %v483_v8  }
 0x13e   :  { %660 = shalt.err (!%p657_p0)
}
 0x13f   :  { %s661_s28 = scalar_lea.hbm %s770_s3, 1024 }
 0x140   :  { %p662_p1 = scmp.ne.s32.totalorder %s770_s3, %s661_s28  ;;  %p665_p2 = scmp.lt.u32.totalorder %s661_s28, %s770_s3 }
 0x142   :  { %p667_p3 = pnand %p665_p2, %p662_p1 }
 0x144   :  { %670 = shalt.err (!%p667_p3)
}
 0x145   :  { %394 = dma.vmem_to_hbm [thread:$0]  %s389_s22, 1024, %s770_s3, [#allocation4], %s679_s24, %s679_s24, %s680_s25  }
 0x146   :  { %675 = dma.done.wait [#allocation4], 1024  }
 0x147   :  { %676 = vsyncadd [#allocation4], 4294966272 }
 0x148   :  { %398 = vsyncpa [#allocation3], 1 }
 0x149   :  { %399 = vsyncpa [#allocation6], 1 }
 0x14a   :  { %400 = vsyncpa [#allocation4], 1 }

</bundles_post_ra>
